<compile_context>
chip_gen: v7x
topology: tpu7x:2x2x1
jax: 0.10.0
libtpu: 0.0.40
codegen_flags: <defaults>
</compile_context>

<pallas_src>
import jax
import jax.numpy as jnp
import numpy as np
from jax.experimental import pallas as pl
from jax.experimental.pallas import tpu as pltpu


def _round_up(v, m):
    return ((v + m - 1) // m) * m


def _pick_tile_n(N, max_c, B):
    """Lane tile for the spatial axis.

    VMEM-aware cap (per-tile footprint ~ (C_in + 2*C_last + live-intermediate)
    * tile_n * 4B, double-buffered blocks included) so a tile that fits
    v5e/v6e's 128 MiB also fits v7x's 64 MiB, and guarantee >= 2 grid steps so
    both v7x TensorCores get work and the pipeline can prefetch.
    """
    if max_c >= 1024:
        cap = 512
    elif max_c >= 512:
        cap = 1024
    else:
        cap = 2048
    tile = min(_round_up(N, 128), cap)
    while B * pl.cdiv(N, tile) < 2 and tile > 128:
        tile = max(128, _round_up(tile // 2, 128))
    return tile


def _make_mlp_conv_kernel(num_layers):
    """Kernel over one (C_in, TN) spatial tile; all layers fused on-chip."""

    def kernel(x_ref, *refs):
        o_ref = refs[-1]
        wb_refs = refs[:-1]                       # w0, b0, w1, b1, ...
        # Activations live in VMEM/vregs the whole chain.  bf16 matmul
        # operands, f32 accumulation; bias-add / ReLU in f32.
        h = x_ref[...].astype(jnp.bfloat16)       # (C_in, TN), N on lanes
        for i in range(num_layers):
            w = wb_refs[2 * i][...]               # bf16 (C_out_i, C_in_i)
            b = wb_refs[2 * i + 1][...]           # f32  (C_out_i, 1)
            acc = jnp.dot(w, h, preferred_element_type=jnp.float32) + b
            if i != num_layers - 1:
                h = jnp.maximum(acc, 0.0).astype(jnp.bfloat16)   # ReLU
            else:
                o_ref[...] = acc.astype(o_ref.dtype)

    return kernel


def mlp_conv_forward(x, weights, biases):
    """MLP_CONV.forward.

    x:       (B, C_in, N) float32   (torch NCL layout)
    weights: list of (C_out_i, C_in_i) arrays (torch Conv1d weight squeezed)
    biases:  list of (C_out_i,) arrays
    returns  (B, C_last, N) float32
    """
    B, C_in, N = x.shape
    num_layers = len(weights)
    C_last = weights[-1].shape[0]
    max_c = max([C_in] + [int(w.shape[0]) for w in weights])

    tile_n = _pick_tile_n(N, max_c, B)
    grid = (B, pl.cdiv(N, tile_n))                # partial last N tile is OK

    in_specs = [pl.BlockSpec((None, C_in, tile_n), lambda b, n: (b, 0, n))]
    args = [x]
    for w, bias in zip(weights, biases):
        co, ci = w.shape
        # Whole weight / bias resident in VMEM; constant block index -> no
        # re-DMA between consecutive grid steps.  Weights in bf16 (MXU
        # operand dtype), biases in f32 (added to the f32 accumulator).
        in_specs.append(pl.BlockSpec((co, ci), lambda b, n: (0, 0)))
        in_specs.append(pl.BlockSpec((co, 1), lambda b, n: (0, 0)))
        args.append(w.astype(jnp.bfloat16))
        args.append(bias.reshape(co, 1).astype(jnp.float32))

    out = pl.pallas_call(
        _make_mlp_conv_kernel(num_layers),
        grid=grid,
        in_specs=in_specs,
        out_specs=pl.BlockSpec((None, C_last, tile_n), lambda b, n: (b, 0, n)),
        out_shape=jax.ShapeDtypeStruct((B, C_last, N), jnp.float32),
        compiler_params=pltpu.CompilerParams(
            dimension_semantics=("parallel", "parallel")),
    )(*args)

    return out


if __name__ == "__main__":
    key = jax.random.PRNGKey(0)

    # Small shapes consistent with MLP_CONV usage: point features over N
    # positions.  in_channel=3, layer_dims=[64, 128, 32], batch=2, N=300
    # (non-multiple of 128, to exercise the partial last lane tile).
    B, C_in, N = 2, 3, 300
    layer_dims = [64, 128, 32]

    keys = jax.random.split(key, 1 + 2 * len(layer_dims))
    x = jax.random.normal(keys[0], (B, C_in, N), jnp.float32)

    # Deterministic PyTorch-default-style uniform init (kernel_size = 1).
    weights, biases = [], []
    last = C_in
    for i, out_c in enumerate(layer_dims):
        fan = last * 1
        w = jax.random.uniform(keys[1 + 2 * i], (out_c, last), jnp.float32,
                               -1.0, 1.0) / np.sqrt(fan)
        b = jax.random.uniform(keys[2 + 2 * i], (out_c,), jnp.float32,
                               -1.0, 1.0) / np.sqrt(fan)
        weights.append(w)
        biases.append(b)
        last = out_c

    y = mlp_conv_forward(x, weights, biases)
    jax.block_until_ready(y)
    assert y.shape == (B, layer_dims[-1], N)

    # Pure-JAX reference of the same forward pass (Conv1d k=1 chain + ReLU)
    # using the same bf16-operand / f32-accumulate numerics as the kernel.
    def ref(xv):
        h = xv
        for i, (w, b) in enumerate(zip(weights, biases)):
            acc = jnp.einsum("oi,bin->bon",
                             w.astype(jnp.bfloat16), h.astype(jnp.bfloat16),
                             preferred_element_type=jnp.float32) \
                  + b[None, :, None]
            h = jnp.maximum(acc, 0.0) if i != len(weights) - 1 else acc
        return h

    expected = ref(x)
    np.testing.assert_allclose(np.asarray(y), np.asarray(expected),
                               rtol=2e-3, atol=2e-3)
    print("KERNEL_OK")
</pallas_src>

<mosaic_0001>
module attributes {stable_mosaic.version = 11 : i64} {
  func.func @kernel(%arg0: i32, %arg1: i32, %arg2: memref<1x3x384xf32, #tpu.memory_space<vmem>>, %arg3: memref<64x3xbf16, #tpu.memory_space<vmem>>, %arg4: memref<64x1xf32, #tpu.memory_space<vmem>>, %arg5: memref<128x64xbf16, #tpu.memory_space<vmem>>, %arg6: memref<128x1xf32, #tpu.memory_space<vmem>>, %arg7: memref<32x128xbf16, #tpu.memory_space<vmem>>, %arg8: memref<32x1xf32, #tpu.memory_space<vmem>>, %arg9: memref<1x32x384xf32, #tpu.memory_space<vmem>>) attributes {dimension_semantics = [#tpu.dimension_semantics<parallel>, #tpu.dimension_semantics<parallel>], iteration_bounds = array<i64: 2, 1>, scalar_prefetch = 0 : i64, scratch_operands = 0 : i64, tpu.core_type = #tpu.core_type<tc>, window_params = [{transform_indices = @transform_0, window_bounds = array<i64: 1, 3, 384>}, {pipeline_mode = #tpu.pipeline_mode<synchronous>, transform_indices = @transform_1, window_bounds = array<i64: 64, 3>}, {pipeline_mode = #tpu.pipeline_mode<synchronous>, transform_indices = @transform_2, window_bounds = array<i64: 64, 1>}, {pipeline_mode = #tpu.pipeline_mode<synchronous>, transform_indices = @transform_3, window_bounds = array<i64: 128, 64>}, {pipeline_mode = #tpu.pipeline_mode<synchronous>, transform_indices = @transform_4, window_bounds = array<i64: 128, 1>}, {pipeline_mode = #tpu.pipeline_mode<synchronous>, transform_indices = @transform_5, window_bounds = array<i64: 32, 128>}, {pipeline_mode = #tpu.pipeline_mode<synchronous>, transform_indices = @transform_6, window_bounds = array<i64: 32, 1>}, {transform_indices = @transform_7, window_bounds = array<i64: 1, 32, 384>}]} {
    %c0 = arith.constant 0 : index
    %c0_0 = arith.constant 0 : index
    %c0_1 = arith.constant 0 : index
    %0 = vector.load %arg2[%c0, %c0_0, %c0_1] : memref<1x3x384xf32, #tpu.memory_space<vmem>>, vector<1x3x384xf32>
    %1 = vector.shape_cast %0 : vector<1x3x384xf32> to vector<3x384xf32>
    %2 = arith.truncf %1 : vector<3x384xf32> to vector<3x384xbf16>
    %c0_2 = arith.constant 0 : index
    %c0_3 = arith.constant 0 : index
    %3 = vector.load %arg3[%c0_2, %c0_3] : memref<64x3xbf16, #tpu.memory_space<vmem>>, vector<64x3xbf16>
    %c0_4 = arith.constant 0 : index
    %c0_5 = arith.constant 0 : index
    %4 = vector.load %arg4[%c0_4, %c0_5] : memref<64x1xf32, #tpu.memory_space<vmem>>, vector<64x1xf32>
    %cst = arith.constant dense<0.000000e+00> : vector<64x384xf32>
    %5 = tpu.matmul %3, %2, %cst {dimension_numbers = #tpu.dot_dimension_numbers<[1], [0], [0], [1], [0, 0, 1, 1], [], []>} : vector<64x3xbf16>, vector<3x384xbf16>, vector<64x384xf32> -> vector<64x384xf32>
    %6 = vector.broadcast %4 : vector<64x1xf32> to vector<64x384xf32>
    %7 = arith.addf %5, %6 : vector<64x384xf32>
    %cst_6 = arith.constant 0.000000e+00 : f32
    %8 = vector.broadcast %cst_6 : f32 to vector<64x384xf32>
    %9 = arith.maximumf %7, %8 : vector<64x384xf32>
    %10 = arith.truncf %9 : vector<64x384xf32> to vector<64x384xbf16>
    %c0_7 = arith.constant 0 : index
    %c0_8 = arith.constant 0 : index
    %11 = vector.load %arg5[%c0_7, %c0_8] : memref<128x64xbf16, #tpu.memory_space<vmem>>, vector<128x64xbf16>
    %c0_9 = arith.constant 0 : index
    %c0_10 = arith.constant 0 : index
    %12 = vector.load %arg6[%c0_9, %c0_10] : memref<128x1xf32, #tpu.memory_space<vmem>>, vector<128x1xf32>
    %cst_11 = arith.constant dense<0.000000e+00> : vector<128x384xf32>
    %13 = tpu.matmul %11, %10, %cst_11 {dimension_numbers = #tpu.dot_dimension_numbers<[1], [0], [0], [1], [0, 0, 1, 1], [], []>} : vector<128x64xbf16>, vector<64x384xbf16>, vector<128x384xf32> -> vector<128x384xf32>
    %14 = vector.broadcast %12 : vector<128x1xf32> to vector<128x384xf32>
    %15 = arith.addf %13, %14 : vector<128x384xf32>
    %cst_12 = arith.constant 0.000000e+00 : f32
    %16 = vector.broadcast %cst_12 : f32 to vector<128x384xf32>
    %17 = arith.maximumf %15, %16 : vector<128x384xf32>
    %18 = arith.truncf %17 : vector<128x384xf32> to vector<128x384xbf16>
    %c0_13 = arith.constant 0 : index
    %c0_14 = arith.constant 0 : index
    %19 = vector.load %arg7[%c0_13, %c0_14] : memref<32x128xbf16, #tpu.memory_space<vmem>>, vector<32x128xbf16>
    %c0_15 = arith.constant 0 : index
    %c0_16 = arith.constant 0 : index
    %20 = vector.load %arg8[%c0_15, %c0_16] : memref<32x1xf32, #tpu.memory_space<vmem>>, vector<32x1xf32>
    %cst_17 = arith.constant dense<0.000000e+00> : vector<32x384xf32>
    %21 = tpu.matmul %19, %18, %cst_17 {dimension_numbers = #tpu.dot_dimension_numbers<[1], [0], [0], [1], [0, 0, 1, 1], [], []>} : vector<32x128xbf16>, vector<128x384xbf16>, vector<32x384xf32> -> vector<32x384xf32>
    %22 = vector.broadcast %20 : vector<32x1xf32> to vector<32x384xf32>
    %23 = arith.addf %21, %22 : vector<32x384xf32>
    %c0_18 = arith.constant 0 : index
    %c0_19 = arith.constant 0 : index
    %c0_20 = arith.constant 0 : index
    %24 = vector.load %arg9[%c0_18, %c0_19, %c0_20] : memref<1x32x384xf32, #tpu.memory_space<vmem>>, vector<1x32x384xf32>
    %25 = vector.shape_cast %24 : vector<1x32x384xf32> to vector<32x384xf32>
    %26 = vector.shape_cast %23 : vector<32x384xf32> to vector<1x32x384xf32>
    tpu.vector_store %arg9[%c0_18, %c0_19, %c0_20], %26 {strides = array<i32>} : memref<1x32x384xf32, #tpu.memory_space<vmem>>, vector<1x32x384xf32>,
    return
  }
  func.func @transform_0(%arg0: i32, %arg1: i32) -> (i32, i32, i32) {
    %c0_i32 = arith.constant 0 : i32
    %c0_i32_0 = arith.constant 0 : i32
    return %arg0, %c0_i32, %arg1 : i32, i32, i32
  }
  func.func @transform_1(%arg0: i32, %arg1: i32) -> (i32, i32) {
    %c0_i32 = arith.constant 0 : i32
    %c0_i32_0 = arith.constant 0 : i32
    %c0_i32_1 = arith.constant 0 : i32
    return %c0_i32, %c0_i32_0 : i32, i32
  }
  func.func @transform_2(%arg0: i32, %arg1: i32) -> (i32, i32) {
    %c0_i32 = arith.constant 0 : i32
    %c0_i32_0 = arith.constant 0 : i32
    %c0_i32_1 = arith.constant 0 : i32
    return %c0_i32, %c0_i32_0 : i32, i32
  }
  func.func @transform_3(%arg0: i32, %arg1: i32) -> (i32, i32) {
    %c0_i32 = arith.constant 0 : i32
    %c0_i32_0 = arith.constant 0 : i32
    %c0_i32_1 = arith.constant 0 : i32
    return %c0_i32, %c0_i32_0 : i32, i32
  }
  func.func @transform_4(%arg0: i32, %arg1: i32) -> (i32, i32) {
    %c0_i32 = arith.constant 0 : i32
    %c0_i32_0 = arith.constant 0 : i32
    %c0_i32_1 = arith.constant 0 : i32
    return %c0_i32, %c0_i32_0 : i32, i32
  }
  func.func @transform_5(%arg0: i32, %arg1: i32) -> (i32, i32) {
    %c0_i32 = arith.constant 0 : i32
    %c0_i32_0 = arith.constant 0 : i32
    %c0_i32_1 = arith.constant 0 : i32
    return %c0_i32, %c0_i32_0 : i32, i32
  }
  func.func @transform_6(%arg0: i32, %arg1: i32) -> (i32, i32) {
    %c0_i32 = arith.constant 0 : i32
    %c0_i32_0 = arith.constant 0 : i32
    %c0_i32_1 = arith.constant 0 : i32
    return %c0_i32, %c0_i32_0 : i32, i32
  }
  func.func @transform_7(%arg0: i32, %arg1: i32) -> (i32, i32, i32) {
    %c0_i32 = arith.constant 0 : i32
    %c0_i32_0 = arith.constant 0 : i32
    return %arg0, %c0_i32, %arg1 : i32, i32, i32
  }
}

</mosaic_0001>

<bundles_post_ra>
// kernel: tpu_custom_call.1
= control target key start
LH: loop header
LB: loop body
LE: loop exit
PB: predicated region body
PF: predicated region fallthrough
CT: control target
= control target key end

     0   :  { %12 = vsyncpa [#allocation3], 0  ;;  %s2036_s0 = inlined_call_operand.vmem [shape: f32[2,3,300], index: 0, kind: input, shape index: {}]   ;;  %s2037_s1 = inlined_call_operand.vmem [shape: bf16[64,3], index: 1, kind: input, shape index: {}]   ;;  %s2038_s2 = inlined_call_operand.vmem [shape: f32[64,1], index: 2, kind: input, shape index: {}]   ;;  %s2039_s3 = inlined_call_operand.vmem [shape: bf16[128,64], index: 3, kind: input, shape index: {}]   ;;  %s2040_s4 = inlined_call_operand.vmem [shape: f32[128,1], index: 4, kind: input, shape index: {}]   ;;  %s2041_s5 = inlined_call_operand.vmem [shape: bf16[32,128], index: 5, kind: input, shape index: {}]   ;;  %s2042_s6 = inlined_call_operand.vmem [shape: f32[32,1], index: 6, kind: input, shape index: {}]   ;;  %s2043_s7 = inlined_call_operand.hbm [shape: f32[2,32,300], index: 7, kind: output, shape index: {}]  }
   0x1   :  { %14 = vsyncpa [#allocation3 + $0x1], 0  ;;  %s1633_s24 = smov 0   ;;  %s1635_s25 = smov 0  }
   0x2   :  { %s1637_s26 = smov 0   ;;  %s1639_s27 = smov 0  }
   0x3   :  { %s1641_s28 = smov 0   ;;  %s1643_s29 = smov 0  }
   0x4 LB: > { %s1301_s30 = sadd.s32 4294967295, %s1586_s29   ;;  %s1302_s8 = sadd.s32 4294967294, %s1586_s29   ;;  %s1586_s29 = sphi %s1643_s29, %s20_s29   ;;  %s1582_s28 = sphi %s1641_s28, %s2050_s28   ;;  %s1578_s27 = sphi %s1639_s27, %s2049_s27   ;;  %s1574_s26 = sphi %s1637_s26, %s2048_s26   ;;  %s1570_s25 = sphi %s1635_s25, %s2047_s25   ;;  %s1566_s24 = sphi %s1633_s24, %s2046_s24  }
   0x5   : > { %s32_s9 = sadd.s32 1, %s1582_s28  ;;  %s195_s10 = sadd.s32 1, %s1574_s26 }
   0x6   : > { %p34_p0 = scmp.ge.s32.totalorder %s32_s9, 2  ;;  %p205_p1 = scmp.ne.s32.totalorder %s1574_s26, %s1570_s25 }
   0x7   : > { %p206_p2 = scmp.eq.s32.totalorder %s1301_s30, 1  ;;  %p211_p3 = scmp.ne.s32.totalorder %s1570_s25, %s1566_s24 }
   0x8   : > { %s2052_s9 = smov (%p34_p0, %s32_s9), 0  ;;  %p212_p5 = scmp.eq.s32.totalorder %s1302_s8, 1 }
   0x9   : > { %p1673_p4 = por %p206_p2, %p205_p1  ;;  %s190_s12 = ssub.s32 %s1582_s28, %s2052_s9 }
   0xa   : > { %p1305_p6 = scmp.ge.s32.totalorder %s1586_s29, 1  ;;  %p193_p7 = scmp.eq.s32.totalorder %s190_s12, 0 }
   0xb   : > { %p1680_p8 = por %p212_p5, %p211_p3  ;;  %p261_p9 = scmp.lt.s32.totalorder %s1586_s29, 3 }
   0xc   : > { %s1686_s14 = scalar_select %p193_p7, %s1574_s26, %s195_s10  }
   0xd   : > { %p262_p10 = pnand %p1305_p6, %p261_p9 }
   0xe   : > { %p298_p11 = scmp.lt.s32.totalorder (!%p262_p10), %s1578_s27, 1  ;;  %vm406_vm0 = vcmask (!%p262_p10), 1040384   ;;  %v1494_v0 = vld [vmem:[%s2037_s1] sm:$0xff] (!%p262_p10)   ;;  %vm393_vm1 = vcmask (!%p262_p10), 23552   ;;  %vm407_vm2 = vcmask (!%p262_p10), 1041408   ;;  %v1588_v1 = vmov (!%p262_p10), 65535  }
   0xf   : > { %265 = sbr.rel (%p262_p10) target bundleno = 808 (0x328), region = 48  ;;  %1377 = vmatprep.mubr.msk.bf16.mxu1 (!%p262_p10), %vm393_vm1, %v1494_v0  ;;  %v408_v2 = vsel (!%p262_p10), %vm406_vm0, 4294967295, %v1588_v1  ;;  %v1589_v3 = vmov (!%p262_p10), 0   ;;  %v325_v4 = vld [vmem:[%s2038_s2] sm:$0xff] (!%p262_p10)  ;;  %v327_v5 = vld [vmem:[%s2038_s2 + $0x10] sm:$0xff] (!%p262_p10)  ;;  %v326_v6 = vld [vmem:[%s2038_s2 + $0x8] sm:$0xff] (!%p262_p10) }
  0x10   : > { %451 = vmatprep.mubr.bf16.mxu0 (!%p262_p10), %v1589_v3  ;;  %1491 = vset.pattern.permute.xlu0 (!%p262_p10), %v1589_v3  ;;  %v409_v8 = vsel (!%p262_p10), %vm407_vm2, %v408_v2, 0  ;;  %v328_v10 = vld [vmem:[%s2038_s2 + $0x18] sm:$0xff] (!%p262_p10)  ;;  %v329_v17 = vld [vmem:[%s2038_s2 + $0x20] sm:$0xff] (!%p262_p10)  ;;  %v1495_v19 = vld [vmem:[%s2037_s1 + $0x8] sm:$0xff] (!%p262_p10)   ;;  %vm745_vm3 = vcmask (!%p262_p10), 523264   ;;  %s294_s10 = sand.u32 (!%p262_p10), 1, %s1570_s25  }
  0x11   : > { %1492 = vset.pattern.permute.xlu1 (!%p262_p10), %v1589_v3  ;;  %335 = vperm.xlu0 (!%p262_p10), %1491, %v325_v4   ;;  %v330_v20 = vld [vmem:[%s2038_s2 + $0x28] sm:$0xff] (!%p262_p10)  ;;  %v1496_v21 = vld [vmem:[%s2037_s1 + $0x10] sm:$0xff] (!%p262_p10)   ;;  %v332_v23 = vld [vmem:[%s2038_s2 + $0x38] sm:$0xff] (!%p262_p10)  ;;  %s1429_s12 = smul.u32 (!%p262_p10), 96, %s294_s10  ;;  %s1590_s22 = smov (!%p262_p10), [#allocation2]  }
  0x12   : > { %345 = vperm.xlu1 (!%p262_p10), %1492, %v327_v5   ;;  %v331_v22 = vld [vmem:[%s2038_s2 + $0x30] sm:$0xff] (!%p262_p10)  ;;  %v609_v24 = vld [vmem:[%s2040_s4] sm:$0xff] (!%p262_p10)  ;;  %v1497_v25 = vld [vmem:[%s2037_s1 + $0x18] sm:$0xff] (!%p262_p10)   ;;  %s1431_s16 = smul.u32 (!%p262_p10), 1536, %s1578_s27  ;;  %s1512_s23 = sshll.u32 (!%p262_p10), %s1590_s22, 4  ;;  %s1513_s23 = int_to_ptr.vmem [resolvable:$false] %s1512_s23 }
  0x13   : > { %v610_v26 = vld [vmem:[%s2040_s4 + $0x8] sm:$0xff] (!%p262_p10)  ;;  %v611_v27 = vld [vmem:[%s2040_s4 + $0x10] sm:$0xff] (!%p262_p10)  ;;  %v612_v28 = vld [vmem:[%s2040_s4 + $0x18] sm:$0xff] (!%p262_p10)  ;;  %s1965_s15 = scalar_lea.vmem (!%p262_p10), [#allocation2], %s1429_s12  ;;  %s1514_s30 = scalar_lea.vmem (!%p262_p10), %s1513_s23, 3072 }
  0x14   : > { %v613_v29 = vld [vmem:[%s2040_s4 + $0x20] sm:$0xff] (!%p262_p10)  ;;  %v614_v30 = vld [vmem:[%s2040_s4 + $0x28] sm:$0xff] (!%p262_p10)  ;;  %v615_v31 = vld [vmem:[%s2040_s4 + $0x30] sm:$0xff] (!%p262_p10)  ;;  %s1981_s20 = scalar_lea.hbm (!%p262_p10), %s2043_s7, %s1431_s16 }
  0x15   : > { %340 = vperm.xlu0 (!%p262_p10), %1491, %v326_v6   ;;  %v616_v32 = vld [vmem:[%s2040_s4 + $0x38] sm:$0xff] (!%p262_p10)  ;;  %v617_v33 = vld [vmem:[%s2040_s4 + $0x40] sm:$0xff] (!%p262_p10)  ;;  %v618_v34 = vld [vmem:[%s2040_s4 + $0x48] sm:$0xff] (!%p262_p10) }
  0x16   : > { %s299_s17 = scalar_select %p298_p11, %s1578_s27, 1  ;;  %350 = vperm.xlu1 %1492, %v328_v10   ;;  %v619_v35 = vld [vmem:[%s2040_s4 + $0x50] sm:$0xff]  ;;  %v620_v36 = vld [vmem:[%s2040_s4 + $0x58] sm:$0xff]  ;;  %v621_v37 = vld [vmem:[%s2040_s4 + $0x60] sm:$0xff] }
  0x17   : > { %v622_v38 = vld [vmem:[%s2040_s4 + $0x68] sm:$0xff]  ;;  %v623_v39 = vld [vmem:[%s2040_s4 + $0x70] sm:$0xff]  ;;  %v624_v40 = vld [vmem:[%s2040_s4 + $0x78] sm:$0xff]  ;;  %s1990_s27 = scalar_lea.sflag [#allocation3], %s294_s10 }
  0x18   : > { %s1430_s18 = smul.u32 12, %s299_s17  ;;  %v1056_v41 = vld [vmem:[%s2042_s6] sm:$0xff]  ;;  %v1057_v42 = vld [vmem:[%s2042_s6 + $0x8] sm:$0xff]  ;;  %v1058_v43 = vld [vmem:[%s2042_s6 + $0x10] sm:$0xff]  ;;  %s1222_s17 = sshll.u32 %s1965_s15, 4  ;;  %s1983_s17 = int_to_ptr.vmem [resolvable:$true] %s1222_s17 }
  0x19   : > { %355 = vperm.xlu0 %1491, %v329_v17   ;;  %v1059_v44 = vld [vmem:[%s2042_s6 + $0x18] sm:$0xff]  ;;  %v1808_v45 = vld [vmem:[%s2039_s3] sm:$0xff]   ;;  %s1508_s21 = scalar_lea.vmem %s1983_s17, 1536  ;;  %p1515_p1 = scmp.lt.s32.totalorder %s1983_s17, %s1513_s23 }
  0x1a   : > { %s305_s8 = scalar_lea.vmem %s2036_s0, %s1430_s18  ;;  %360 = vperm.xlu1 %1492, %v330_v20   ;;  %p1509_p12 = scmp.ne.s32.totalorder %s1983_s17, %s1508_s21 }
  0x1b   : > { %v310_v7 = vld [vmem:[%s305_s8 + $0x8] sm:$0x7]  ;;  %v309_v9 = vld [vmem:[%s305_s8] sm:$0x77]  ;;  %p1516_p2 = scmp.lt.s32.totalorder %s1514_s30, %s1508_s21 }
  0x1c   : > { %v316_v11 = vpack.c.bf16 %v310_v7, %v310_v7  ;;  %v312_v12 = vcombine.high %v309_v9, %v309_v9  ;;  %v314_v13 = vpack.c.bf16 %v309_v9, %v309_v9  ;;  %p1510_p13 = pnand %p1509_p12, %p1673_p4 }
  0x1d   : > { %365 = vperm.xlu0 %1491, %v331_v22   ;;  %p1517_p3 = por %p1516_p2, %p1515_p1 }
  0x1e   : > { %v417_v14 = vand.u32 %v409_v8, %v316_v11  ;;  %v315_v15 = vpack.c.bf16 %v312_v12, %v312_v12  ;;  %v411_v16 = vand.u32 %v409_v8, %v314_v13  ;;  %370 = vperm.xlu1 %1492, %v332_v23   ;;  %p1511_p0 = pneg %p1510_p13 }
  0x20   : > { %1375 = vmatprep.subr.bf16.mxu1 %v417_v14  ;;  %v414_v18 = vand.u32 %v409_v8, %v315_v15  ;;  %p1518_p5 = pnand %p1517_p3, %p1511_p0 }
  0x21   : > { %1376 = vmatpush3.bf16.msra.mxu1 %v417_v14  ;;  %627 = vperm.xlu0 %1491, %v609_v24  }
  0x22   : > { %419 = vmatprep.subr.bf16.mxu0 %v414_v18  ;;  %632 = vperm.xlu1 %1492, %v610_v26  }
  0x23   : > { %420 = vmatpush1.bf16.msra.mxu0 %v411_v16 }
  0x24   : > { %1378 = vmatmul.mubr.msk.bf16.vlgmr.msra.gmra.mrb[0].mxu1 %vm393_vm1, %v1495_v19 }
  0x25   : > { %1381 = vmatprep.mubr.msk.bf16.mxu1 %vm393_vm1, %v1496_v21  ;;  %637 = vperm.xlu0 %1491, %v611_v27  }
  0x26   : > { %1311 = vmatmul.mubr.msk.bf16.vlgmr.msra.gmra.mrb[0].mxu0 %vm393_vm1, %v1494_v0  ;;  %642 = vperm.xlu1 %1492, %v612_v28  }
  0x27   : > { %461 = vmatprep.mubr.bf16.mxu0 %v1589_v3 }
  0x29   : > { %647 = vperm.xlu0 %1491, %v613_v29  }
  0x2a   : > { %652 = vperm.xlu1 %1492, %v614_v30  }
  0x2c   : > { %1382 = vmatmul.mubr.msk.bf16.gmra.mrb[4].mxu1 %vm393_vm1, %v1497_v25 }
  0x2d   : > { %802 = vmatprep.mubr.bf16.mxu1 %v1589_v3  ;;  %657 = vperm.xlu0 %1491, %v615_v31  }
  0x2e   : > { %1312 = vmatmul.mubr.msk.bf16.gmra.mrb[4].mxu0 %vm393_vm1, %v1495_v19  ;;  %662 = vperm.xlu1 %1492, %v616_v32  }
  0x2f   : > { %471 = vmatprep.mubr.bf16.mxu0 %v1589_v3 }
  0x31   : > { %667 = vperm.xlu0 %1491, %v617_v33  }
  0x32   : > { %672 = vperm.xlu1 %1492, %v618_v34  }
  0x35   : > { %677 = vperm.xlu0 %1491, %v619_v35  }
  0x36   : > { %1313 = vmatmul.mubr.msk.bf16.gmra.mrb[8].mxu0 %vm393_vm1, %v1496_v21  ;;  %682 = vperm.xlu1 %1492, %v620_v36  }
  0x37   : > { %481 = vmatprep.mubr.bf16.mxu0 %v1589_v3 }
  0x39   : > { %687 = vperm.xlu0 %1491, %v621_v37  }
  0x3a   : > { %692 = vperm.xlu1 %1492, %v622_v38  }
  0x3d   : > { %697 = vperm.xlu0 %1491, %v623_v39  }
  0x3e   : > { %1314 = vmatmul.mubr.msk.bf16.gmra.mrb[12].mxu0 %vm393_vm1, %v1497_v25  ;;  %702 = vperm.xlu1 %1492, %v624_v40  }
  0x3f   : > { %1393 = vmatprep.mubr.msk.bf16.mxu0 %vm745_vm3, %v1808_v45 }
  0x41   : > { %1062 = vperm.xlu0 %1491, %v1056_v41  }
  0x42   : > { %1067 = vperm.xlu1 %1492, %v1057_v42  }
  0x45   : > { %1072 = vperm.xlu0 %1491, %v1058_v43  }
  0x46   : > { %1077 = vperm.xlu1 %1492, %v1059_v44  }
  0x90   : > { %v336_v46 = vpop.permute.xlu0 %335 }
  0x91   : > { %v346_v47 = vpop.permute.xlu1 %345 }
  0x94   : > { %v341_v48 = vpop.permute.xlu0 %340 }
  0x95   : > { %v351_v49 = vpop.permute.xlu1 %350 }
  0x98   : > { %v1812_v50 = vpop.permute.xlu0 %355 }
  0x99   : > { %v1814_v52 = vpop.permute.xlu1 %360 }
  0x9c   : > { %v1816_v12 = vpop.permute.xlu0 %365 }
  0x9d   : > { %v1818_v17 = vpop.permute.xlu1 %370 }
  0xf7   : > { %v1379_v51 = vpop.f32.mrb[0].mxu1 }
  0xf8   : > { %v535_v53 = vadd.f32 %v1379_v51, %v346_v47  ;;  %v526_v54 = vpop.f32.mrb[1].mxu1 }
  0xf9   : > { %v527_v55 = vadd.f32 %v526_v54, %v336_v46  ;;  %v453_v56 = vpop.f32.mrb[0].mxu0  ;;  %v1380_v57 = vpop.f32.mrb[2].mxu1 }
  0xfa   : > { %v565_v58 = vmax.f32 %v535_v53, 0.0  ;;  %v454_v59 = vadd.f32 %v453_v56, %v336_v46  ;;  %v538_v60 = vadd.f32 %v1380_v57, %v351_v49  ;;  %v455_v61 = vpop.f32.mrb[1].mxu0  ;;  %v529_v62 = vpop.f32.mrb[3].mxu1 }
  0xfb   : > { %v559_v63 = vmax.f32 %v527_v55, 0.0  ;;  %v456_v0 = vadd.f32 %v455_v61, %v336_v46  ;;  %v530_v1 = vadd.f32 %v529_v62, %v341_v48  ;;  %v457_v2 = vpop.f32.mrb[2].mxu0 }
  0xfc   : > { %v568_v4 = vmax.f32 %v538_v60, 0.0  ;;  %v458_v5 = vadd.f32 %v457_v2, %v341_v48  ;;  %v459_v6 = vpop.f32.mrb[3].mxu0  ;;  %v557_v9 = vmax.f32 %v454_v59, 0.0 }
  0xfd   : > { %v562_v7 = vmax.f32 %v530_v1, 0.0  ;;  %v460_v8 = vadd.f32 %v459_v6, %v341_v48  ;;  %v558_v13 = vmax.f32 %v456_v0, 0.0 }
  0xfe   : > { %v586_v10 = vpack.c.bf16 %v568_v4, %v565_v58  ;;  %v560_v11 = vmax.f32 %v458_v5, 0.0  ;;  %v1499_v58 = vld [vmem:[%s2039_s3 + $0x8] sm:$0xff]  }
  0xff   : > { %v583_v14 = vpack.c.bf16 %v562_v7, %v559_v63  ;;  %v561_v15 = vmax.f32 %v460_v8, 0.0  ;;  %v1383_v16 = vpop.f32.mrb[4].mxu1 }
 0x100   : > { %v581_v18 = vpack.c.bf16 %v560_v11, %v557_v9  ;;  %v551_v19 = vadd.f32 %v1383_v16, %v1816_v12  ;;  %v542_v20 = vpop.f32.mrb[5].mxu1  ;;  %v1501_v9 = vld [vmem:[%s2039_s3 + $0x18] sm:$0xff]  }
 0x101   : > { %v582_v21 = vpack.c.bf16 %v561_v15, %v558_v13  ;;  %v543_v22 = vadd.f32 %v542_v20, %v1812_v50  ;;  %v463_v23 = vpop.f32.mrb[4].mxu0  ;;  %v1384_v24 = vpop.f32.mrb[6].mxu1  ;;  %1385 = vmatprep.subr.bf16.mxu0 %v583_v14  ;;  %v1502_v13 = vld [vmem:[%s2039_s3 + $0x20] sm:$0xff]  }
 0x102   : > { %v577_v25 = vmax.f32 %v551_v19, 0.0  ;;  %v464_v26 = vadd.f32 %v463_v23, %v346_v47  ;;  %v554_v27 = vadd.f32 %v1384_v24, %v1818_v17  ;;  %v465_v28 = vpop.f32.mrb[5].mxu0  ;;  %v545_v29 = vpop.f32.mrb[7].mxu1  ;;  %1386 = vmatpush3.bf16.msra.mxu0 %v583_v14  ;;  %v1505_v19 = vld [vmem:[%s2039_s3 + $0x38] sm:$0xff]  }
 0x103   : > { %v571_v30 = vmax.f32 %v543_v22, 0.0  ;;  %v466_v31 = vadd.f32 %v465_v28, %v346_v47  ;;  %v546_v32 = vadd.f32 %v545_v29, %v1814_v52  ;;  %v467_v33 = vpop.f32.mrb[6].mxu0  ;;  %770 = vmatprep.subr.bf16.mxu1 %v582_v21  ;;  %1387 = vmatprep.subr.bf16.mxu0 %v586_v10  ;;  %v628_v20 = vpop.permute.xlu0 %627 }
 0x104   : > { %v580_v34 = vmax.f32 %v554_v27, 0.0  ;;  %v468_v35 = vadd.f32 %v467_v33, %v351_v49  ;;  %v469_v36 = vpop.f32.mrb[7].mxu0  ;;  %771 = vmatpush1.bf16.msra.mxu1 %v581_v18  ;;  %v563_v39 = vmax.f32 %v464_v26, 0.0  ;;  %v1504_v18 = vld [vmem:[%s2039_s3 + $0x30] sm:$0xff]   ;;  %v633_v21 = vpop.permute.xlu1 %632 }
 0x105   : > { %v574_v37 = vmax.f32 %v546_v32, 0.0  ;;  %v470_v38 = vadd.f32 %v469_v36, %v351_v49  ;;  %v564_v42 = vmax.f32 %v466_v31, 0.0 }
 0x106   : > { %v592_v40 = vpack.c.bf16 %v580_v34, %v577_v25  ;;  %v566_v41 = vmax.f32 %v468_v35, 0.0  ;;  %1388 = vmatpush3.bf16.msra.mxu0 %v586_v10 }
 0x107   : > { %v589_v43 = vpack.c.bf16 %v574_v37, %v571_v30  ;;  %v567_v44 = vmax.f32 %v470_v38, 0.0  ;;  %v1883_v22 = vpop.permute.xlu0 %637 }
 0x108   : > { %v584_v46 = vpack.c.bf16 %v566_v41, %v563_v39  ;;  %v1885_v23 = vpop.permute.xlu1 %642 }
 0x109   : > { %v585_v47 = vpack.c.bf16 %v567_v44, %v564_v42  ;;  %v473_v48 = vpop.f32.mrb[8].mxu0  ;;  %1389 = vmatprep.subr.bf16.mxu0 %v589_v43 }
 0x10a   : > { %v474_v51 = vadd.f32 %v473_v48, %v1812_v50  ;;  %v475_v53 = vpop.f32.mrb[9].mxu0  ;;  %1390 = vmatpush3.bf16.msra.mxu0 %v589_v43 }
 0x10b   : > { %v476_v54 = vadd.f32 %v475_v53, %v1812_v50  ;;  %v477_v55 = vpop.f32.mrb[10].mxu0  ;;  %772 = vmatprep.subr.bf16.mxu1 %v585_v47  ;;  %1391 = vmatprep.subr.bf16.mxu0 %v592_v40  ;;  %v1500_v50 = vld [vmem:[%s2039_s3 + $0x10] sm:$0xff]   ;;  %v1887_v24 = vpop.permute.xlu0 %647 }
 0x10c   : > { %v478_v49 = vadd.f32 %v477_v55, %v1814_v52  ;;  %v479_v56 = vpop.f32.mrb[11].mxu0  ;;  %773 = vmatpush1.bf16.msra.mxu1 %v584_v46  ;;  %v569_v59 = vmax.f32 %v474_v51, 0.0  ;;  %v1889_v25 = vpop.permute.xlu1 %652 }
 0x10d   : > { %v480_v57 = vadd.f32 %v479_v56, %v1814_v52  ;;  %v570_v61 = vmax.f32 %v476_v54, 0.0 }
 0x10e   : > { %v572_v60 = vmax.f32 %v478_v49, 0.0  ;;  %1392 = vmatpush3.bf16.msra.mxu0 %v592_v40 }
 0x10f   : > { %v573_v62 = vmax.f32 %v480_v57, 0.0  ;;  %v1891_v26 = vpop.permute.xlu0 %657 }
 0x110   : > { %v587_v63 = vpack.c.bf16 %v572_v60, %v569_v59  ;;  %v1894_v30 = vpop.permute.xlu1 %662 }
 0x111   : > { %v588_v0 = vpack.c.bf16 %v573_v62, %v570_v61  ;;  %v483_v1 = vpop.f32.mrb[12].mxu0  ;;  %1394 = vmatmul.mubr.msk.bf16.vlgmr.msra.gmra.mrb[16].mxu0 %vm745_vm3, %v1499_v58 }
 0x112   : > { %v484_v52 = vadd.f32 %v483_v1, %v1816_v12  ;;  %v485_v2 = vpop.f32.mrb[13].mxu0  ;;  %1397 = vmatprep.mubr.msk.bf16.mxu0 %vm745_vm3, %v1500_v50 }
 0x113   : > { %v486_v4 = vadd.f32 %v485_v2, %v1816_v12  ;;  %v487_v5 = vpop.f32.mrb[14].mxu0  ;;  %774 = vmatprep.subr.bf16.mxu1 %v588_v0  ;;  %v1896_v33 = vpop.permute.xlu0 %667 }
 0x114   : > { %v488_v6 = vadd.f32 %v487_v5, %v1818_v17  ;;  %v489_v7 = vpop.f32.mrb[15].mxu0  ;;  %775 = vmatpush1.bf16.msra.mxu1 %v587_v63  ;;  %v575_v10 = vmax.f32 %v484_v52, 0.0  ;;  %v1899_v42 = vpop.permute.xlu1 %672 }
 0x115   : > { %v490_v8 = vadd.f32 %v489_v7, %v1818_v17  ;;  %v576_v14 = vmax.f32 %v486_v4, 0.0  ;;  %v1503_v17 = vld [vmem:[%s2039_s3 + $0x28] sm:$0xff]  }
 0x116   : > { %v578_v11 = vmax.f32 %v488_v6, 0.0 }
 0x117   : > { %v579_v12 = vmax.f32 %v490_v8, 0.0  ;;  %v1901_v46 = vpop.permute.xlu0 %677 }
 0x118   : > { %v590_v15 = vpack.c.bf16 %v578_v11, %v575_v10 }
 0x119   : > { %v591_v16 = vpack.c.bf16 %v579_v12, %v576_v14  ;;  %1398 = vmatmul.mubr.msk.bf16.gmra.mrb[20].mxu0 %vm745_vm3, %v1501_v9 }
 0x11a   : > { %1401 = vmatprep.mubr.msk.bf16.mxu0 %vm745_vm3, %v1502_v13 }
 0x11b   : > { %776 = vmatprep.subr.bf16.mxu1 %v591_v16  ;;  %v1909_v61 = vpop.permute.xlu0 %687 }
 0x11c   : > { %777 = vmatpush1.bf16.msra.mxu1 %v590_v15 }
 0x11f   : > { %1327 = vmatmul.mubr.msk.bf16.vlgmr.msra.gmra.mrb[8].mxu1 %vm745_vm3, %v1808_v45  ;;  %v1880_v45 = vld [vmem:[%s2041_s5] sm:$0xff]  }
 0x120   : > { %812 = vmatprep.mubr.bf16.mxu1 %v1589_v3 }
 0x121   : > { %1402 = vmatmul.mubr.msk.bf16.gmra.mrb[24].mxu0 %vm745_vm3, %v1503_v17 }
 0x122   : > { %1405 = vmatprep.mubr.msk.bf16.mxu0 %vm745_vm3, %v1504_v18 }
 0x127   : > { %1328 = vmatmul.mubr.msk.bf16.gmra.mrb[12].mxu1 %vm745_vm3, %v1499_v58  ;;  %v1907_v58 = vpop.permute.xlu1 %682 }
 0x128   : > { %822 = vmatprep.mubr.bf16.mxu1 %v1589_v3 }
 0x129   : > { %1406 = vmatmul.mubr.msk.bf16.gmra.mrb[28].mxu0 %vm745_vm3, %v1505_v19 }
 0x12a   : > { %1124 = vmatprep.mubr.bf16.mxu0 %v1589_v3 }
 0x12b   : > { %v1914_v16 = vpop.permute.xlu1 %692 }
 0x12f   : > { %1329 = vmatmul.mubr.msk.bf16.gmra.mrb[16].mxu1 %vm745_vm3, %v1500_v50 }
 0x130   : > { %832 = vmatprep.mubr.bf16.mxu1 %v1589_v3 }
 0x137   : > { %1330 = vmatmul.mubr.msk.bf16.gmra.mrb[20].mxu1 %vm745_vm3, %v1501_v9 }
 0x138   : > { %842 = vmatprep.mubr.bf16.mxu1 %v1589_v3 }
 0x13f   : > { %1331 = vmatmul.mubr.msk.bf16.gmra.mrb[24].mxu1 %vm745_vm3, %v1502_v13 }
 0x140   : > { %852 = vmatprep.mubr.bf16.mxu1 %v1589_v3 }
 0x147   : > { %1332 = vmatmul.mubr.msk.bf16.gmra.mrb[28].mxu1 %vm745_vm3, %v1503_v17 }
 0x148   : > { %862 = vmatprep.mubr.bf16.mxu1 %v1589_v3 }
 0x14f   : > { %1333 = vmatmul.mubr.msk.bf16.gmra.mrb[32].mxu1 %vm745_vm3, %v1504_v18 }
 0x150   : > { %872 = vmatprep.mubr.bf16.mxu1 %v1589_v3 }
 0x157   : > { %1334 = vmatmul.mubr.msk.bf16.gmra.mrb[36].mxu1 %vm745_vm3, %v1505_v19 }
 0x158   : > { %1425 = vmatprep.mubr.bf16.mxu1 %v1880_v45 }
 0x1e4   : > { %v1395_v27 = vpop.f32.mrb[16].mxu0 }
 0x1e5   : > { %v926_v28 = vadd.f32 %v1395_v27, %v1883_v22  ;;  %v917_v29 = vpop.f32.mrb[17].mxu0 }
 0x1e6   : > { %v918_v31 = vadd.f32 %v917_v29, %v628_v20  ;;  %v1396_v32 = vpop.f32.mrb[18].mxu0 }
 0x1e7   : > { %v929_v34 = vadd.f32 %v1396_v32, %v1885_v23  ;;  %v920_v35 = vpop.f32.mrb[19].mxu0  ;;  %v988_v37 = vmax.f32 %v926_v28, 0.0 }
 0x1e8   : > { %v921_v36 = vadd.f32 %v920_v35, %v633_v21  ;;  %v982_v39 = vmax.f32 %v918_v31, 0.0 }
 0x1e9   : > { %v991_v38 = vmax.f32 %v929_v34, 0.0  ;;  %v1917_v34 = vpop.permute.xlu0 %697 }
 0x1ea   : > { %v985_v40 = vmax.f32 %v921_v36, 0.0 }
 0x1eb   : > { %v1033_v41 = vpack.c.bf16 %v991_v38, %v988_v37 }
 0x1ec   : > { %v1030_v43 = vpack.c.bf16 %v985_v40, %v982_v39  ;;  %v1399_v44 = vpop.f32.mrb[20].mxu0 }
 0x1ed   : > { %v942_v47 = vadd.f32 %v1399_v44, %v1891_v26  ;;  %v933_v48 = vpop.f32.mrb[21].mxu0 }
 0x1ee   : > { %v934_v51 = vadd.f32 %v933_v48, %v1887_v24  ;;  %v1400_v53 = vpop.f32.mrb[22].mxu0  ;;  %1409 = vmatprep.subr.bf16.mxu1 %v1030_v43 }
 0x1ef   : > { %v945_v54 = vadd.f32 %v1400_v53, %v1894_v30  ;;  %v936_v55 = vpop.f32.mrb[23].mxu0  ;;  %1410 = vmatpush3.bf16.msra.mxu1 %v1030_v43  ;;  %v1000_v56 = vmax.f32 %v942_v47, 0.0 }
 0x1f0   : > { %v937_v49 = vadd.f32 %v936_v55, %v1889_v25  ;;  %1411 = vmatprep.subr.bf16.mxu1 %v1033_v41  ;;  %v994_v59 = vmax.f32 %v934_v51, 0.0  ;;  %v1923_v51 = vpop.permute.xlu1 %702 }
 0x1f1   : > { %v1003_v57 = vmax.f32 %v945_v54, 0.0 }
 0x1f2   : > { %v997_v60 = vmax.f32 %v937_v49, 0.0  ;;  %v804_v50 = vpop.f32.mrb[8].mxu1 }
 0x1f3   : > { %v1039_v62 = vpack.c.bf16 %v1003_v57, %v1000_v56  ;;  %v805_v63 = vadd.f32 %v804_v50, %v628_v20  ;;  %v806_v0 = vpop.f32.mrb[9].mxu1  ;;  %1412 = vmatpush3.bf16.msra.mxu1 %v1033_v41 }
 0x1f4   : > { %v1036_v1 = vpack.c.bf16 %v997_v60, %v994_v59  ;;  %v807_v52 = vadd.f32 %v806_v0, %v628_v20  ;;  %v808_v2 = vpop.f32.mrb[10].mxu1  ;;  %v1403_v4 = vpop.f32.mrb[24].mxu0 }
 0x1f5   : > { %v809_v5 = vadd.f32 %v808_v2, %v633_v21  ;;  %v958_v6 = vadd.f32 %v1403_v4, %v1901_v46  ;;  %v810_v7 = vpop.f32.mrb[11].mxu1  ;;  %v949_v8 = vpop.f32.mrb[25].mxu0  ;;  %v980_v13 = vmax.f32 %v805_v63, 0.0 }
 0x1f6   : > { %v811_v9 = vadd.f32 %v810_v7, %v633_v21  ;;  %v950_v10 = vadd.f32 %v949_v8, %v1896_v33  ;;  %v1404_v11 = vpop.f32.mrb[26].mxu0  ;;  %1413 = vmatprep.subr.bf16.mxu1 %v1036_v1  ;;  %v981_v17 = vmax.f32 %v807_v52, 0.0 }
 0x1f7   : > { %v983_v14 = vmax.f32 %v809_v5, 0.0  ;;  %v961_v12 = vadd.f32 %v1404_v11, %v1907_v58  ;;  %v952_v15 = vpop.f32.mrb[27].mxu0  ;;  %1414 = vmatpush3.bf16.msra.mxu1 %v1036_v1  ;;  %v1012_v27 = vmax.f32 %v958_v6, 0.0 }
 0x1f8   : > { %v984_v18 = vmax.f32 %v811_v9, 0.0  ;;  %v953_v19 = vadd.f32 %v952_v15, %v1899_v42  ;;  %1415 = vmatprep.subr.bf16.mxu1 %v1039_v62  ;;  %v1006_v29 = vmax.f32 %v950_v10, 0.0 }
 0x1f9   : > { %v1028_v20 = vpack.c.bf16 %v983_v14, %v980_v13  ;;  %v1015_v21 = vmax.f32 %v961_v12, 0.0 }
 0x1fa   : > { %v1029_v28 = vpack.c.bf16 %v984_v18, %v981_v17  ;;  %v1009_v31 = vmax.f32 %v953_v19, 0.0  ;;  %v814_v32 = vpop.f32.mrb[12].mxu1 }
 0x1fb   : > { %v1045_v35 = vpack.c.bf16 %v1015_v21, %v1012_v27  ;;  %v815_v36 = vadd.f32 %v814_v32, %v1883_v22  ;;  %v816_v37 = vpop.f32.mrb[13].mxu1  ;;  %1416 = vmatpush3.bf16.msra.mxu1 %v1039_v62 }
 0x1fc   : > { %v1042_v38 = vpack.c.bf16 %v1009_v31, %v1006_v29  ;;  %v817_v39 = vadd.f32 %v816_v37, %v1883_v22  ;;  %v818_v40 = vpop.f32.mrb[14].mxu1  ;;  %v1407_v41 = vpop.f32.mrb[28].mxu0  ;;  %1092 = vmatprep.subr.bf16.mxu0 %v1029_v28 }
 0x1fd   : > { %v819_v43 = vadd.f32 %v818_v40, %v1885_v23  ;;  %v974_v44 = vadd.f32 %v1407_v41, %v1917_v34  ;;  %v820_v47 = vpop.f32.mrb[15].mxu1  ;;  %v965_v48 = vpop.f32.mrb[29].mxu0  ;;  %1093 = vmatpush1.bf16.msra.mxu0 %v1028_v20  ;;  %v986_v49 = vmax.f32 %v815_v36, 0.0 }
 0x1fe   : > { %v821_v53 = vadd.f32 %v820_v47, %v1885_v23  ;;  %v966_v54 = vadd.f32 %v965_v48, %v1909_v61  ;;  %v1408_v55 = vpop.f32.mrb[30].mxu0  ;;  %1417 = vmatprep.subr.bf16.mxu1 %v1042_v38  ;;  %v987_v59 = vmax.f32 %v817_v39, 0.0 }
 0x1ff   : > { %v989_v22 = vmax.f32 %v819_v43, 0.0  ;;  %v977_v56 = vadd.f32 %v1408_v55, %v1923_v51  ;;  %v968_v57 = vpop.f32.mrb[31].mxu0  ;;  %1418 = vmatpush3.bf16.msra.mxu1 %v1042_v38  ;;  %v1024_v63 = vmax.f32 %v974_v44, 0.0 }
 0x200   : > { %v990_v60 = vmax.f32 %v821_v53, 0.0  ;;  %v969_v50 = vadd.f32 %v968_v57, %v1914_v16  ;;  %1419 = vmatprep.subr.bf16.mxu1 %v1045_v35  ;;  %v1018_v23 = vmax.f32 %v966_v54, 0.0 }
 0x201   : > { %v1031_v62 = vpack.c.bf16 %v989_v22, %v986_v49  ;;  %v1027_v0 = vmax.f32 %v977_v56, 0.0 }
 0x202   : > { %v1032_v1 = vpack.c.bf16 %v990_v60, %v987_v59  ;;  %v1021_v52 = vmax.f32 %v969_v50, 0.0  ;;  %v824_v2 = vpop.f32.mrb[16].mxu1 }
 0x203   : > { %v1051_v4 = vpack.c.bf16 %v1027_v0, %v1024_v63  ;;  %v825_v5 = vadd.f32 %v824_v2, %v1887_v24  ;;  %v826_v6 = vpop.f32.mrb[17].mxu1  ;;  %1420 = vmatpush3.bf16.msra.mxu1 %v1045_v35 }
 0x204   : > { %v1048_v7 = vpack.c.bf16 %v1021_v52, %v1018_v23  ;;  %v827_v8 = vadd.f32 %v826_v6, %v1887_v24  ;;  %v828_v9 = vpop.f32.mrb[18].mxu1  ;;  %1094 = vmatprep.subr.bf16.mxu0 %v1032_v1  ;;  %v1936_v24 = vld [vmem:[%s2041_s5 + $0x8] sm:$0xff]  }
 0x205   : > { %v829_v10 = vadd.f32 %v828_v9, %v1889_v25  ;;  %v830_v11 = vpop.f32.mrb[19].mxu1  ;;  %1095 = vmatpush1.bf16.msra.mxu0 %v1031_v62  ;;  %v992_v14 = vmax.f32 %v825_v5, 0.0 }
 0x206   : > { %v831_v13 = vadd.f32 %v830_v11, %v1889_v25  ;;  %1421 = vmatprep.subr.bf16.mxu1 %v1048_v7  ;;  %v993_v15 = vmax.f32 %v827_v8, 0.0 }
 0x207   : > { %v995_v12 = vmax.f32 %v829_v10, 0.0  ;;  %1422 = vmatpush3.bf16.msra.mxu1 %v1048_v7 }
 0x208   : > { %v996_v17 = vmax.f32 %v831_v13, 0.0  ;;  %1423 = vmatprep.subr.bf16.mxu1 %v1051_v4 }
 0x209   : > { %v1034_v18 = vpack.c.bf16 %v995_v12, %v992_v14 }
 0x20a   : > { %v1035_v19 = vpack.c.bf16 %v996_v17, %v993_v15  ;;  %v834_v20 = vpop.f32.mrb[20].mxu1 }
 0x20b   : > { %v835_v27 = vadd.f32 %v834_v20, %v1891_v26  ;;  %v836_v21 = vpop.f32.mrb[21].mxu1  ;;  %1424 = vmatpush3.bf16.msra.mxu1 %v1051_v4 }
 0x20c   : > { %v837_v25 = vadd.f32 %v836_v21, %v1891_v26  ;;  %v838_v28 = vpop.f32.mrb[22].mxu1  ;;  %1096 = vmatprep.subr.bf16.mxu0 %v1035_v19 }
 0x20d   : > { %v839_v29 = vadd.f32 %v838_v28, %v1894_v30  ;;  %v840_v31 = vpop.f32.mrb[23].mxu1  ;;  %1097 = vmatpush1.bf16.msra.mxu0 %v1034_v18  ;;  %v998_v35 = vmax.f32 %v835_v27, 0.0 }
 0x20e   : > { %v841_v32 = vadd.f32 %v840_v31, %v1894_v30  ;;  %1426 = vmatmul.mubr.bf16.vlgmr.msra.gmra.mrb[40].mxu1 %v1936_v24  ;;  %v999_v37 = vmax.f32 %v837_v25, 0.0 }
 0x20f   : > { %v1001_v36 = vmax.f32 %v839_v29, 0.0 }
 0x210   : > { %v1002_v38 = vmax.f32 %v841_v32, 0.0 }
 0x211   : > { %v1037_v39 = vpack.c.bf16 %v1001_v36, %v998_v35 }
 0x212   : > { %v1038_v40 = vpack.c.bf16 %v1002_v38, %v999_v37  ;;  %v844_v41 = vpop.f32.mrb[24].mxu1  ;;  %v1068_v38 = vpop.permute.xlu1 %1067 }
 0x213   : > { %v845_v43 = vadd.f32 %v844_v41, %v1896_v33  ;;  %v846_v26 = vpop.f32.mrb[25].mxu1 }
 0x214   : > { %v847_v44 = vadd.f32 %v846_v26, %v1896_v33  ;;  %v848_v47 = vpop.f32.mrb[26].mxu1  ;;  %1098 = vmatprep.subr.bf16.mxu0 %v1038_v40 }
 0x215   : > { %v849_v48 = vadd.f32 %v848_v47, %v1899_v42  ;;  %v850_v53 = vpop.f32.mrb[27].mxu1  ;;  %1099 = vmatpush1.bf16.msra.mxu0 %v1037_v39  ;;  %v1004_v54 = vmax.f32 %v845_v43, 0.0 }
 0x216   : > { %v851_v30 = vadd.f32 %v850_v53, %v1899_v42  ;;  %v1005_v49 = vmax.f32 %v847_v44, 0.0  ;;  %v1078_v43 = vpop.permute.xlu1 %1077 }
 0x217   : > { %v1007_v55 = vmax.f32 %v849_v48, 0.0 }
 0x218   : > { %v1008_v22 = vmax.f32 %v851_v30, 0.0 }
 0x219   : > { %v1040_v56 = vpack.c.bf16 %v1007_v55, %v1004_v54 }
 0x21a   : > { %v1041_v57 = vpack.c.bf16 %v1008_v22, %v1005_v49  ;;  %v854_v59 = vpop.f32.mrb[28].mxu1 }
 0x21b   : > { %v855_v60 = vadd.f32 %v854_v59, %v1901_v46  ;;  %v856_v50 = vpop.f32.mrb[29].mxu1 }
 0x21c   : > { %v857_v33 = vadd.f32 %v856_v50, %v1901_v46  ;;  %v858_v62 = vpop.f32.mrb[30].mxu1  ;;  %1100 = vmatprep.subr.bf16.mxu0 %v1041_v57 }
 0x21d   : > { %v859_v63 = vadd.f32 %v858_v62, %v1907_v58  ;;  %v860_v0 = vpop.f32.mrb[31].mxu1  ;;  %1101 = vmatpush1.bf16.msra.mxu0 %v1040_v56  ;;  %v1010_v1 = vmax.f32 %v855_v60, 0.0 }
 0x21e   : > { %v861_v42 = vadd.f32 %v860_v0, %v1907_v58  ;;  %v1011_v52 = vmax.f32 %v857_v33, 0.0 }
 0x21f   : > { %v1013_v23 = vmax.f32 %v859_v63, 0.0 }
 0x220   : > { %v1014_v2 = vmax.f32 %v861_v42, 0.0 }
 0x221   : > { %v1043_v4 = vpack.c.bf16 %v1013_v23, %v1010_v1 }
 0x222   : > { %v1044_v5 = vpack.c.bf16 %v1014_v2, %v1011_v52  ;;  %v864_v6 = vpop.f32.mrb[32].mxu1 }
 0x223   : > { %v865_v7 = vadd.f32 %v864_v6, %v1909_v61  ;;  %v866_v8 = vpop.f32.mrb[33].mxu1 }
 0x224   : > { %v867_v46 = vadd.f32 %v866_v8, %v1909_v61  ;;  %v868_v9 = vpop.f32.mrb[34].mxu1  ;;  %1102 = vmatprep.subr.bf16.mxu0 %v1044_v5 }
 0x225   : > { %v869_v10 = vadd.f32 %v868_v9, %v1914_v16  ;;  %v870_v11 = vpop.f32.mrb[35].mxu1  ;;  %1103 = vmatpush1.bf16.msra.mxu0 %v1043_v4  ;;  %v1016_v13 = vmax.f32 %v865_v7, 0.0 }
 0x226   : > { %v871_v58 = vadd.f32 %v870_v11, %v1914_v16  ;;  %v1017_v12 = vmax.f32 %v867_v46, 0.0 }
 0x227   : > { %v1019_v14 = vmax.f32 %v869_v10, 0.0 }
 0x228   : > { %v1020_v15 = vmax.f32 %v871_v58, 0.0 }
 0x229   : > { %v1046_v17 = vpack.c.bf16 %v1019_v14, %v1016_v13 }
 0x22a   : > { %v1047_v18 = vpack.c.bf16 %v1020_v15, %v1017_v12  ;;  %v874_v19 = vpop.f32.mrb[36].mxu1 }
 0x22b   : > { %v875_v20 = vadd.f32 %v874_v19, %v1917_v34  ;;  %v876_v27 = vpop.f32.mrb[37].mxu1 }
 0x22c   : > { %v877_v61 = vadd.f32 %v876_v27, %v1917_v34  ;;  %v878_v21 = vpop.f32.mrb[38].mxu1  ;;  %1104 = vmatprep.subr.bf16.mxu0 %v1047_v18  ;;  %v1063_v34 = vpop.permute.xlu0 %1062 }
 0x22d   : > { %v879_v25 = vadd.f32 %v878_v21, %v1923_v51  ;;  %v880_v28 = vpop.f32.mrb[39].mxu1  ;;  %1105 = vmatpush1.bf16.msra.mxu0 %v1046_v17  ;;  %v1022_v29 = vmax.f32 %v875_v20, 0.0 }
 0x22e   : > { %v881_v16 = vadd.f32 %v880_v28, %v1923_v51  ;;  %v1023_v32 = vmax.f32 %v877_v61, 0.0 }
 0x22f   : > { %v1025_v31 = vmax.f32 %v879_v25, 0.0 }
 0x230   : > { %v1026_v35 = vmax.f32 %v881_v16, 0.0  ;;  %v1073_v51 = vpop.permute.xlu0 %1072 }
 0x231   : > { %v1049_v36 = vpack.c.bf16 %v1025_v31, %v1022_v29 }
 0x232   : > { %v1050_v37 = vpack.c.bf16 %v1026_v35, %v1023_v32 }
 0x234   : > { %1106 = vmatprep.subr.bf16.mxu0 %v1050_v37 }
 0x235   : > { %1107 = vmatpush1.bf16.msra.mxu0 %v1049_v36 }
 0x238   : > { %1125 = vmatmul.mubr.bf16.vlgmr.msra.gmra.mrb[32].mxu0 %v1880_v45 }
 0x239   : > { %1134 = vmatprep.mubr.bf16.mxu0 %v1589_v3 }
 0x240   : > { %1135 = vmatmul.mubr.bf16.gmra.mrb[36].mxu0 %v1936_v24 }
 0x2e1   : > { %v1427_v39 = vpop.f32.mrb[40].mxu1 }
 0x2e2   : > { %v1188_v40 = vadd.f32 %v1427_v39, %v1073_v51  ;;  %v1179_v41 = vpop.f32.mrb[41].mxu1 }
 0x2e3   : > { %v1180_v26 = vadd.f32 %v1179_v41, %v1063_v34  ;;  %v1428_v44 = vpop.f32.mrb[42].mxu1 }
 0x2e4   : > { %1202 = vst [vmem:[%s1965_s15 + $0x40] sm:$0xff] %v1188_v40  ;;  %v1191_v3 = vadd.f32 %v1428_v44, %v1078_v43  ;;  %v1182_v45 = vpop.f32.mrb[43].mxu1 }
 0x2e5   : > { %1196 = vst [vmem:[%s1965_s15 + $0x10] sm:$0xff] %v1180_v26  ;;  %v1183_v24 = vadd.f32 %v1182_v45, %v1068_v38 }
 0x2e6   : > { %1205 = vst [vmem:[%s1965_s15 + $0x58] sm:$0xff] %v1191_v3 }
 0x2e7   : > { %1199 = vst [vmem:[%s1965_s15 + $0x28] sm:$0xff] %v1183_v24 }
 0x30b   : > { %v1126_v47 = vpop.f32.mrb[32].mxu0 }
 0x30c   : > { %v1127_v48 = vadd.f32 %v1126_v47, %v1063_v34  ;;  %v1128_v53 = vpop.f32.mrb[33].mxu0 }
 0x30d   : > { %v1129_v30 = vadd.f32 %v1128_v53, %v1063_v34  ;;  %v1130_v54 = vpop.f32.mrb[34].mxu0 }
 0x30e   : > { %1194 = vst [vmem:[%s1965_s15] sm:$0xff] %v1127_v48  ;;  %v1131_v55 = vadd.f32 %v1130_v54, %v1068_v38  ;;  %v1132_v49 = vpop.f32.mrb[35].mxu0 }
 0x30f   : > { %1195 = vst [vmem:[%s1965_s15 + $0x8] sm:$0xff] %v1129_v30  ;;  %v1133_v22 = vadd.f32 %v1132_v49, %v1068_v38 }
 0x310   : > { %1197 = vst [vmem:[%s1965_s15 + $0x18] sm:$0xff] %v1131_v55 }
 0x311   : > { %1198 = vst [vmem:[%s1965_s15 + $0x20] sm:$0xff] %v1133_v22 }
 0x313   : > { %v1136_v56 = vpop.f32.mrb[36].mxu0 }
 0x314   : > { %v1137_v57 = vadd.f32 %v1136_v56, %v1073_v51  ;;  %v1138_v59 = vpop.f32.mrb[37].mxu0 }
 0x315   : > { %v1139_v60 = vadd.f32 %v1138_v59, %v1073_v51  ;;  %v1140_v50 = vpop.f32.mrb[38].mxu0 }
 0x316   : > { %1200 = vst [vmem:[%s1965_s15 + $0x30] sm:$0xff] %v1137_v57  ;;  %v1141_v33 = vadd.f32 %v1140_v50, %v1078_v43  ;;  %v1142_v62 = vpop.f32.mrb[39].mxu0 }
 0x317   : > { %1201 = vst [vmem:[%s1965_s15 + $0x38] sm:$0xff] %v1139_v60  ;;  %v1143_v63 = vadd.f32 %v1142_v62, %v1078_v43 }
 0x318   : > { %1203 = vst [vmem:[%s1965_s15 + $0x48] sm:$0xff] %v1141_v33 }
 0x319   : > { %1204 = vst [vmem:[%s1965_s15 + $0x50] sm:$0xff] %v1143_v63 }
 0x31a   : > { %1521 = shalt.err (!%p1518_p5)
}
 0x31b   : > { %s1522_s8 = scalar_lea.hbm %s1981_s20, 1536  ;;  %s1526_s15 = scalar_lea.hbm %s2043_s7, 3072 }
 0x31c   : > { %p1523_p6 = scmp.ne.s32.totalorder %s1981_s20, %s1522_s8  ;;  %p1527_p10 = scmp.lt.u32.totalorder %s1981_s20, %s2043_s7 }
 0x31d   : > { %p1528_p11 = scmp.lt.u32.totalorder %s1526_s15, %s1522_s8  ;;  %p1530_p13 = scmp.lt.u32.totalorder %s1522_s8, %s1981_s20 }
 0x31e   : > { %p1524_p7 = pnand %p1523_p6, %p1673_p4 }
 0x31f   : > { %p1529_p12 = por %p1528_p11, %p1527_p10 }
 0x320   : > { %p1525_p9 = pneg %p1524_p7 }
 0x321   : > { %p1531_p0 = por %p1530_p13, %p1529_p12 }
 0x323   : > { %p1532_p1 = pnand %p1531_p0, %p1525_p9 }
 0x325   : > { %1535 = shalt.err (!%p1532_p1)
}
 0x326   : > { %s1591_s19 = smov 384   ;;  %s1592_s21 = smov 24  }
 0x327   : > { %1432 = dma.vmem_to_hbm [thread:$0]  (%p1673_p4), %s1983_s17, 1536, %s1981_s20, %s1990_s27, %s1591_s19, %s1591_s19, %s1592_s21  }
 0x328 PF: > { %p1438_p2 = scmp.ge.s32.totalorder %s1586_s29, 2  ;;  %s1237_s22 = sand.u32 1, %s1566_s24  }
 0x329   : > { %s1238_s23 = scalar_lea.sflag [#allocation3], %s1237_s22 }
 0x32a   : > { %p1435_p3 = pnand %p1438_p2, %p1680_p8 }
 0x32c   : > { %1561 = dma.done.wait (!%p1435_p3), %s1238_s23, 1536  }
 0x32d   : > { %1563 = vsyncadd (!%p1435_p3), %s1238_s23, 4294965760  ;;  %s20_s29 = sadd.s32 1, %s1586_s29   ;;  %s2046_s24 = smov %s1570_s25 }
 0x32e   : > { %p17_p5 = scmp.ge.s32.totalorder %s20_s29, 4   ;;  %s2047_s25 = smov %s1574_s26 }
 0x32f   : > { %s2048_s26 = smov %s1686_s14  ;;  %s2049_s27 = smov %s1582_s28 }
 0x330   : > { %s2050_s28 = smov %s2052_s9  ;;  %19 = sbr.rel (!%p17_p5) target bundleno = 4 (0x4), region = 83 }
 0x337   :  { %1243 = vsyncpa [#allocation3], 1 }
 0x338   :  { %1245 = vsyncpa [#allocation3 + $0x1], 1 }

</bundles_post_ra>
